<compile_context>
chip_gen: v7x
topology: tpu7x:2x2x1
jax: 0.10.0
libtpu: 0.0.40
codegen_flags: <defaults>
</compile_context>

<pallas_src>
import functools

import jax
import jax.numpy as jnp
from jax.experimental import pallas as pl
from jax.experimental.pallas import tpu as pltpu

ACT_DTYPE = jnp.bfloat16                     # activations / matmul operands (MXU-native)
VMEM_LIMIT_BYTES = 32 * 1024 * 1024          # explicit scoped-VMEM budget (v5e default is only 16 MiB)


# ---------------------------------------------------------------------------
# tile-size helpers (block shapes must keep second-minor % 8, minor % 128, or equal the full dim)
# ---------------------------------------------------------------------------
def _largest_divisor(n, cap, multiple_of=1):
    for d in range(min(cap, n), 0, -1):
        if n % d == 0 and d % multiple_of == 0:
            return d
    return None


def _row_tile(m, cap=512):
    """Second-minor block dim: multiple of 8, or the full extent."""
    if m <= cap:
        return m
    d = _largest_divisor(m, cap, multiple_of=8)
    return d if d is not None else m


def _lane_tile(n, cap=256):
    """Minor (lane) block dim: multiple of 128, or the full extent."""
    if n <= cap:
        return n
    d = _largest_divisor(n, cap, multiple_of=128)
    return d if d is not None else n


def _plain_tile(n, cap):
    """Leading block dim: any divisor."""
    cap = max(1, cap)
    if n <= cap:
        return n
    return _largest_divisor(n, cap) or n


def _round_up(v, m):
    return ((v + m - 1) // m) * m


def _compiler_params(n_axes):
    return pltpu.CompilerParams(
        dimension_semantics=("parallel",) * n_axes,
        vmem_limit_bytes=VMEM_LIMIT_BYTES)


# ---------------------------------------------------------------------------
# Pallas kernels
# ---------------------------------------------------------------------------
def _matmul_bias_kernel(x_ref, w_ref, b_ref, o_ref, *, relu):
    # x: (TM, K)  w: (K, TN)  b: (1, TN)  o: (TM, TN)
    acc = jnp.dot(x_ref[...].astype(jnp.bfloat16),
                  w_ref[...].astype(jnp.bfloat16),
                  preferred_element_type=jnp.float32)
    acc = acc + b_ref[...].astype(jnp.float32)
    if relu:
        acc = jnp.maximum(acc, 0.0)
    o_ref[...] = acc.astype(o_ref.dtype)


def _conv3x3_kernel(*refs, relu, residual):
    # x: (1, H+2, Wp+2, Cin)  w: (3, 3, Cin, TCo)  b: (1, TCo)
    # [r: (1, H, Wp, TCo)]    o: (1, H, Wp, TCo)          (Wp = W rounded up to 8)
    if residual:
        x_ref, w_ref, b_ref, r_ref, o_ref = refs
    else:
        x_ref, w_ref, b_ref, o_ref = refs
        r_ref = None
    _, H, Wp, TCo = o_ref.shape
    Cin = x_ref.shape[-1]
    x = x_ref[0].astype(jnp.bfloat16)                               # (H+2, Wp+2, Cin)
    # Accumulator starts from the broadcast bias (no separate bias pass).
    acc = jnp.broadcast_to(b_ref[...].astype(jnp.float32), (H * Wp, TCo))
    for kh in range(3):                                             # 9 stride-1 taps -> 9 MXU matmuls
        for kw in range(3):
            patch = x[kh:kh + H, kw:kw + Wp, :].reshape(H * Wp, Cin)
            acc = acc + jnp.dot(patch,
                                w_ref[kh, kw].astype(jnp.bfloat16),
                                preferred_element_type=jnp.float32)
    if relu:
        acc = jnp.maximum(acc, 0.0)
    acc = acc.reshape(H, Wp, TCo)
    if residual:
        acc = acc + r_ref[0].astype(jnp.float32)
    o_ref[0] = acc.astype(o_ref.dtype)


def _avgpool2x2_kernel(x_ref, o_ref):
    # x: (1, 4, TH, Wo, C) -- the 2x2 window elements live on a leading axis, so the 4-way
    #                         sum is plain VPU adds with no lane-offset slices.
    # o: (1, TH, Wo, C)
    s = (x_ref[0, 0].astype(jnp.float32) + x_ref[0, 1].astype(jnp.float32) +
         x_ref[0, 2].astype(jnp.float32) + x_ref[0, 3].astype(jnp.float32))
    o_ref[0] = (s * 0.25).astype(o_ref.dtype)


# ---------------------------------------------------------------------------
# op wrappers (NHWC layout)
# ---------------------------------------------------------------------------
def conv1x1_nhwc(x, w, b, *, relu=False):
    """1x1 conv == matmul over channels. x:(N,H,W,Cin)  w:(Cin,Cout)  b:(Cout,)."""
    N, H, W, Cin = x.shape
    Cout = w.shape[1]
    M = N * H * W
    xf = x.reshape(M, Cin)
    tm = _row_tile(M)
    tn = _lane_tile(Cout)
    out = pl.pallas_call(
        functools.partial(_matmul_bias_kernel, relu=relu),
        out_shape=jax.ShapeDtypeStruct((M, Cout), ACT_DTYPE),
        grid=(M // tm, Cout // tn),
        in_specs=[pl.BlockSpec((tm, Cin), lambda i, j: (i, 0)),
                  pl.BlockSpec((Cin, tn), lambda i, j: (0, j)),
                  pl.BlockSpec((1, tn), lambda i, j: (0, j))],
        out_specs=pl.BlockSpec((tm, tn), lambda i, j: (i, j)),
        compiler_params=_compiler_params(2),
    )(xf, w, b.reshape(1, Cout))
    return out.reshape(N, H, W, Cout)


def conv3x3_nhwc(x, w_hwio, b, *, relu=False, residual=None):
    """3x3 / stride-1 / pad-1 conv with fused ReLU / residual add.

    x:(N,H,W,Cin)  w:(3,3,Cin,Cout)  b:(Cout,)  residual:(N,H,W,Cout) or None.
    W is rounded up to a multiple of 8 (zero padded) so the in-kernel
    (H, Wp, C) -> (H*Wp, C) flatten stays layout-clean; extra columns are cropped afterwards.
    For realistic SD-adapter shapes W is already a multiple of 8, so this costs nothing.
    """
    N, H, W, Cin = x.shape
    Cout = w_hwio.shape[-1]
    Wp = _round_up(W, 8)
    xp = jnp.pad(x, ((0, 0), (1, 1), (1, 1 + Wp - W), (0, 0)))
    tco = _lane_tile(Cout)

    inputs = [xp, w_hwio, b.reshape(1, Cout)]
    in_specs = [pl.BlockSpec((1, H + 2, Wp + 2, Cin), lambda n, c: (n, 0, 0, 0)),
                pl.BlockSpec((3, 3, Cin, tco), lambda n, c: (0, 0, 0, c)),
                pl.BlockSpec((1, tco), lambda n, c: (0, c))]
    if residual is not None:
        r = residual if Wp == W else jnp.pad(residual, ((0, 0), (0, 0), (0, Wp - W), (0, 0)))
        inputs.append(r)
        in_specs.append(pl.BlockSpec((1, H, Wp, tco), lambda n, c: (n, 0, 0, c)))

    out = pl.pallas_call(
        functools.partial(_conv3x3_kernel, relu=relu, residual=residual is not None),
        out_shape=jax.ShapeDtypeStruct((N, H, Wp, Cout), ACT_DTYPE),
        grid=(N, Cout // tco),
        in_specs=in_specs,
        out_specs=pl.BlockSpec((1, H, Wp, tco), lambda n, c: (n, 0, 0, c)),
        compiler_params=_compiler_params(2),
    )(*inputs)
    # TODO(synk): for very large spatial extents also tile H (needs overlapping halo windows ->
    # manual DMA); full-height blocks are fine at SD-adapter resolutions.
    return out if Wp == W else out[:, :, :W, :]


def avg_pool2x2_nhwc(x, *, target_block_bytes=4 * 1024 * 1024):
    """AvgPool2d(kernel=2, stride=2) on NHWC  (the Downsample(use_conv=False) path)."""
    N, H, W, C = x.shape
    Ho, Wo = H // 2, W // 2
    x = x[:, :2 * Ho, :2 * Wo, :]
    # Pack the 2x2 window into a leading axis: (N, 4, Ho, Wo, C).
    xp = x.reshape(N, Ho, 2, Wo, 2, C).transpose(0, 2, 4, 1, 3, 5).reshape(N, 4, Ho, Wo, C)
    # TODO(synk): this packing could be fused into the producing conv's output layout to save
    # one HBM pass for this purely bandwidth-bound op.
    row_bytes = 4 * Wo * C * xp.dtype.itemsize
    th = _plain_tile(Ho, target_block_bytes // max(1, row_bytes))
    return pl.pallas_call(
        _avgpool2x2_kernel,
        out_shape=jax.ShapeDtypeStruct((N, Ho, Wo, C), ACT_DTYPE),
        grid=(N, Ho // th),
        in_specs=[pl.BlockSpec((1, 4, th, Wo, C), lambda n, h: (n, 0, h, 0, 0))],
        out_specs=pl.BlockSpec((1, th, Wo, C), lambda n, h: (n, h, 0, 0)),
        compiler_params=_compiler_params(2),
    )(xp)


# ---------------------------------------------------------------------------
# modules (mirror the PyTorch classes)
# ---------------------------------------------------------------------------
def pixel_unshuffle_nchw(x, r):
    N, C, H, W = x.shape
    x = x.reshape(N, C, H // r, r, W // r, r)
    x = x.transpose(0, 1, 3, 5, 2, 4)
    return x.reshape(N, C * r * r, H // r, W // r)


def _conv_init(key, ksize, cin, cout):
    kw, kb = jax.random.split(key)
    fan_in = cin * ksize * ksize
    bound = 1.0 / (fan_in ** 0.5)                       # PyTorch Conv2d default init scale
    shape = (cin, cout) if ksize == 1 else (ksize, ksize, cin, cout)
    w = jax.random.uniform(kw, shape, jnp.float32, -bound, bound).astype(ACT_DTYPE)
    b = jax.random.uniform(kb, (cout,), jnp.float32, -bound, bound)
    return w, b


class ResnetBlockLight:
    def __init__(self, c, key):
        k1, k2 = jax.random.split(key)
        self.w1, self.b1 = _conv_init(k1, 3, c, c)
        self.w2, self.b2 = _conv_init(k2, 3, c, c)

    def __call__(self, x):
        h = conv3x3_nhwc(x, self.w1, self.b1, relu=True)          # block1 + ReLU (fused)
        return conv3x3_nhwc(h, self.w2, self.b2, residual=x)      # block2 + skip (fused)


class Extractor:
    def __init__(self, in_c, inter_c, out_c, nums_rb, down, key):
        keys = jax.random.split(key, nums_rb + 2)
        self.wi, self.bi = _conv_init(keys[0], 1, in_c, inter_c)
        self.body = [ResnetBlockLight(inter_c, keys[2 + i]) for i in range(nums_rb)]
        self.wo, self.bo = _conv_init(keys[1], 1, inter_c, out_c)
        self.down = down

    def __call__(self, x):
        if self.down:
            x = avg_pool2x2_nhwc(x)                               # Downsample(use_conv=False)
        x = conv1x1_nhwc(x, self.wi, self.bi)
        for blk in self.body:
            x = blk(x)
        return conv1x1_nhwc(x, self.wo, self.bo)


class AdapterLight:
    """Pallas port of Adapter_light (PixelUnshuffle(8) + 4 extractor stages)."""
    # TODO(synk): Downsample(use_conv=True) and the dims=1/3 variants are never used by
    # Adapter_light and are not ported.

    def __init__(self, channels=(320, 640, 1280, 1280), nums_rb=3, cin=64, key=None):
        key = key if key is not None else jax.random.PRNGKey(0)
        keys = jax.random.split(key, len(channels))
        self.channels = tuple(channels)
        self.cin = cin
        self.body = []
        for i, ch in enumerate(channels):
            in_c = cin if i == 0 else channels[i - 1]
            self.body.append(Extractor(in_c, ch // 4, ch, nums_rb,
                                       down=(i != 0), key=keys[i]))

    def __call__(self, x_nchw):
        x = pixel_unshuffle_nchw(x_nchw, 8)                       # nn.PixelUnshuffle(8)
        x = jnp.transpose(x, (0, 2, 3, 1)).astype(ACT_DTYPE)      # NCHW -> NHWC, bf16 activations
        features = []
        for ext in self.body:
            x = ext(x)
            features.append(jnp.transpose(x, (0, 3, 1, 2)).astype(jnp.float32))
        return features


# ---------------------------------------------------------------------------
# pure-JAX reference (same bf16-operand / f32-accumulate policy) for validation
# ---------------------------------------------------------------------------
def _ref_conv1x1(x, w, b):
    y = jnp.dot(x, w, preferred_element_type=jnp.float32) + b
    return y.astype(ACT_DTYPE)


def _ref_conv3x3(x, w, b, *, relu=False, residual=None):
    y = jax.lax.conv_general_dilated(
        x, w, window_strides=(1, 1), padding=((1, 1), (1, 1)),
        dimension_numbers=("NHWC", "HWIO", "NHWC"),
        preferred_element_type=jnp.float32) + b
    if relu:
        y = jnp.maximum(y, 0.0)
    if residual is not None:
        y = y + residual.astype(jnp.float32)
    return y.astype(ACT_DTYPE)


def _ref_pool(x):
    N, H, W, C = x.shape
    y = x.astype(jnp.float32).reshape(N, H // 2, 2, W // 2, 2, C).mean(axis=(2, 4))
    return y.astype(ACT_DTYPE)


def adapter_reference(model, x_nchw):
    x = pixel_unshuffle_nchw(x_nchw, 8)
    x = jnp.transpose(x, (0, 2, 3, 1)).astype(ACT_DTYPE)
    feats = []
    for ext in model.body:
        if ext.down:
            x = _ref_pool(x)
        x = _ref_conv1x1(x, ext.wi, ext.bi)
        for blk in ext.body:
            h = _ref_conv3x3(x, blk.w1, blk.b1, relu=True)
            x = _ref_conv3x3(h, blk.w2, blk.b2, residual=x)
        x = _ref_conv1x1(x, ext.wo, ext.bo)
        feats.append(jnp.transpose(x, (0, 3, 1, 2)).astype(jnp.float32))
    return feats


# ---------------------------------------------------------------------------
if __name__ == "__main__":
    key = jax.random.PRNGKey(0)
    kx, km = jax.random.split(key)

    # Small config consistent with Adapter_light: PixelUnshuffle(8) needs H, W % 8 == 0 and the
    # three avg-pool downsamples need H/8 >= 8  ->  64x64 input with 1 image channel (cin=64).
    x = jax.random.normal(kx, (2, 1, 64, 64), jnp.float32)
    model = AdapterLight(channels=(16, 32, 64, 64), nums_rb=2, cin=64, key=km)

    feats = jax.block_until_ready(model(x))

    expected = [(2, 16, 8, 8), (2, 32, 4, 4), (2, 64, 2, 2), (2, 64, 1, 1)]
    assert [tuple(f.shape) for f in feats] == expected, [f.shape for f in feats]

    refs = adapter_reference(model, x)
    for i, (f, r) in enumerate(zip(feats, refs)):
        err = float(jnp.max(jnp.abs(f - r)))
        assert jnp.allclose(f, r, atol=5e-2, rtol=5e-2), (i, err)

    print("KERNEL_OK")
</pallas_src>

<mosaic_0001>
module attributes {stable_mosaic.version = 11 : i64} {
  func.func @_matmul_bias_kernel(%arg0: i32, %arg1: i32, %arg2: memref<128x64xbf16, #tpu.memory_space<vmem>>, %arg3: memref<64x4xbf16, #tpu.memory_space<vmem>>, %arg4: memref<1x4xf32, #tpu.memory_space<vmem>>, %arg5: memref<128x4xbf16, #tpu.memory_space<vmem>>) attributes {dimension_semantics = [#tpu.dimension_semantics<parallel>, #tpu.dimension_semantics<parallel>], iteration_bounds = array<i64: 1, 1>, scalar_prefetch = 0 : i64, scratch_operands = 0 : i64, tpu.core_type = #tpu.core_type<tc>, window_params = [{transform_indices = @transform_0, window_bounds = array<i64: 128, 64>}, {transform_indices = @transform_1, window_bounds = array<i64: 64, 4>}, {transform_indices = @transform_2, window_bounds = array<i64: 1, 4>}, {transform_indices = @transform_3, window_bounds = array<i64: 128, 4>}]} {
    %c0 = arith.constant 0 : index
    %c0_0 = arith.constant 0 : index
    %0 = vector.load %arg2[%c0, %c0_0] : memref<128x64xbf16, #tpu.memory_space<vmem>>, vector<128x64xbf16>
    %c0_1 = arith.constant 0 : index
    %c0_2 = arith.constant 0 : index
    %1 = vector.load %arg3[%c0_1, %c0_2] : memref<64x4xbf16, #tpu.memory_space<vmem>>, vector<64x4xbf16>
    %cst = arith.constant dense<0.000000e+00> : vector<128x4xf32>
    %2 = tpu.matmul %0, %1, %cst {dimension_numbers = #tpu.dot_dimension_numbers<[1], [0], [0], [1], [0, 0, 1, 1], [], []>} : vector<128x64xbf16>, vector<64x4xbf16>, vector<128x4xf32> -> vector<128x4xf32>
    %c0_3 = arith.constant 0 : index
    %c0_4 = arith.constant 0 : index
    %3 = vector.load %arg4[%c0_3, %c0_4] : memref<1x4xf32, #tpu.memory_space<vmem>>, vector<1x4xf32>
    %4 = vector.broadcast %3 : vector<1x4xf32> to vector<128x4xf32>
    %5 = arith.addf %2, %4 : vector<128x4xf32>
    %6 = arith.truncf %5 : vector<128x4xf32> to vector<128x4xbf16>
    %c0_5 = arith.constant 0 : index
    %c0_6 = arith.constant 0 : index
    %7 = vector.load %arg5[%c0_5, %c0_6] : memref<128x4xbf16, #tpu.memory_space<vmem>>, vector<128x4xbf16>
    tpu.vector_store %arg5[%c0_5, %c0_6], %6 {strides = array<i32>} : memref<128x4xbf16, #tpu.memory_space<vmem>>, vector<128x4xbf16>,
    return
  }
  func.func @transform_0(%arg0: i32, %arg1: i32) -> (i32, i32) {
    %c0_i32 = arith.constant 0 : i32
    %c0_i32_0 = arith.constant 0 : i32
    return %arg0, %c0_i32 : i32, i32
  }
  func.func @transform_1(%arg0: i32, %arg1: i32) -> (i32, i32) {
    %c0_i32 = arith.constant 0 : i32
    %c0_i32_0 = arith.constant 0 : i32
    return %c0_i32, %arg1 : i32, i32
  }
  func.func @transform_2(%arg0: i32, %arg1: i32) -> (i32, i32) {
    %c0_i32 = arith.constant 0 : i32
    %c0_i32_0 = arith.constant 0 : i32
    return %c0_i32, %arg1 : i32, i32
  }
  func.func @transform_3(%arg0: i32, %arg1: i32) -> (i32, i32) {
    %c0_i32 = arith.constant 0 : i32
    return %arg0, %arg1 : i32, i32
  }
}

</mosaic_0001>

<bundles_post_ra>
// kernel: tpu_custom_call.1
= control target key start
LH: loop header
LB: loop body
LE: loop exit
PB: predicated region body
PF: predicated region fallthrough
CT: control target
= control target key end

     0   :  { %vm110_vm0 = vcmask 523264   ;;  %vm296_vm1 = vcmask 27648   ;;  %s557_s1 = inlined_call_operand.vmem [shape: bf16[64,4], index: 1, kind: input, shape index: {}]   ;;  %s558_s0 = inlined_call_operand.vmem [shape: bf16[128,64], index: 0, kind: input, shape index: {}]   ;;  %s559_s2 = inlined_call_operand.vmem [shape: f32[1,4], index: 2, kind: input, shape index: {}]   ;;  %s560_s3 = inlined_call_operand.vmem [shape: bf16[128,4], index: 3, kind: output, shape index: {}]  }
   0x1   :  { %v414_v0 = vld [vmem:[%s557_s1] sm:$0xff]   ;;  %v415_v1 = vld [vmem:[%s557_s1 + $0x8] sm:$0xff]   ;;  %v416_v2 = vld [vmem:[%s557_s1 + $0x10] sm:$0xff]  }
   0x2   :  { %382 = vmatprep.subr.bf16.mxu0 %v414_v0  ;;  %406 = vmatprep.subr.bf16.mxu1 %v414_v0  ;;  %v418_v3 = vld [vmem:[%s558_s0] sm:$0xff]   ;;  %v417_v5 = vld [vmem:[%s557_s1 + $0x18] sm:$0xff]   ;;  %v420_v6 = vld [vmem:[%s558_s0 + $0x8] sm:$0xff]  }
   0x3   :  { %383 = vmatpush3.bf16.msra.mxu0 %v414_v0  ;;  %410 = vmatpush3.bf16.msra.mxu1 %v414_v0  ;;  %v419_v4 = vld [vmem:[%s558_s0 + $0x20] sm:$0xff]   ;;  %v421_v7 = vld [vmem:[%s558_s0 + $0x28] sm:$0xff]   ;;  %v422_v8 = vld [vmem:[%s558_s0 + $0x10] sm:$0xff]  }
   0x4   :  { %384 = vmatprep.subr.bf16.mxu0 %v415_v1  ;;  %407 = vmatprep.subr.bf16.mxu1 %v415_v1  ;;  %v423_v9 = vld [vmem:[%s558_s0 + $0x30] sm:$0xff]   ;;  %v424_v10 = vld [vmem:[%s558_s0 + $0x18] sm:$0xff]   ;;  %v317_v12 = vld [vmem:[%s559_s2] ss:$0 sm:$0xff] }
   0x5   :  { %390 = vmatprep.mubr.msk.bf16.mxu0 %vm110_vm0, %v418_v3  ;;  %398 = vmatprep.mubr.msk.bf16.mxu1 %vm110_vm0, %v419_v4  ;;  %v425_v11 = vld [vmem:[%s558_s0 + $0x38] sm:$0xff]  }
   0x7   :  { %385 = vmatpush3.bf16.msra.mxu0 %v415_v1  ;;  %411 = vmatpush3.bf16.msra.mxu1 %v415_v1 }
   0x8   :  { %386 = vmatprep.subr.bf16.mxu0 %v416_v2  ;;  %408 = vmatprep.subr.bf16.mxu1 %v416_v2 }
   0xb   :  { %387 = vmatpush3.bf16.msra.mxu0 %v416_v2  ;;  %412 = vmatpush3.bf16.msra.mxu1 %v416_v2 }
   0xc   :  { %388 = vmatprep.subr.bf16.mxu0 %v417_v5  ;;  %409 = vmatprep.subr.bf16.mxu1 %v417_v5 }
   0xf   :  { %389 = vmatpush3.bf16.msra.mxu0 %v417_v5  ;;  %413 = vmatpush3.bf16.msra.mxu1 %v417_v5 }
  0x12   :  { %391 = vmatmul.mubr.msk.bf16.vlgmr.msra.gmra.mrb[0].mxu0 %vm110_vm0, %v420_v6  ;;  %399 = vmatmul.mubr.msk.bf16.vlgmr.msra.gmra.mrb[0].mxu1 %vm110_vm0, %v421_v7 }
  0x13   :  { %394 = vmatprep.mubr.msk.bf16.mxu0 %vm110_vm0, %v422_v8  ;;  %402 = vmatprep.mubr.msk.bf16.mxu1 %vm110_vm0, %v423_v9 }
  0x1a   :  { %395 = vmatmul.mubr.msk.bf16.gmra.mrb[4].mxu0 %vm110_vm0, %v424_v10  ;;  %403 = vmatmul.mubr.msk.bf16.gmra.mrb[4].mxu1 %vm110_vm0, %v425_v11 }
  0xe5   :  { %v392_v13 = vpop.f32.mrb[0].mxu0  ;;  %v400_v14 = vpop.f32.mrb[0].mxu1 }
  0xe6   :  { %v178_v15 = vadd.f32 %v392_v13, %v317_v12  ;;  %v210_v16 = vadd.f32 %v400_v14, %v317_v12  ;;  %v169_v17 = vpop.f32.mrb[1].mxu0  ;;  %v201_v18 = vpop.f32.mrb[1].mxu1 }
  0xe7   :  { %v170_v19 = vadd.f32 %v317_v12, %v169_v17  ;;  %v202_v20 = vadd.f32 %v317_v12, %v201_v18  ;;  %v393_v21 = vpop.f32.mrb[2].mxu0  ;;  %v401_v22 = vpop.f32.mrb[2].mxu1 }
  0xe8   :  { %v356_v23 = vpack.c.bf16 %v178_v15, %v178_v15  ;;  %v364_v24 = vpack.c.bf16 %v210_v16, %v210_v16  ;;  %v181_v25 = vadd.f32 %v393_v21, %v317_v12  ;;  %v213_v26 = vadd.f32 %v401_v22, %v317_v12  ;;  %v172_v27 = vpop.f32.mrb[3].mxu0  ;;  %v204_v28 = vpop.f32.mrb[3].mxu1 }
  0xe9   :  { %v354_v29 = vpack.c.bf16 %v170_v19, %v170_v19  ;;  %v362_v30 = vpack.c.bf16 %v202_v20, %v202_v20  ;;  %v173_v31 = vadd.f32 %v317_v12, %v172_v27  ;;  %v205_v32 = vadd.f32 %v317_v12, %v204_v28 }
  0xea   :  { %299 = vst.msk [vmem:[%s560_s3 + $0x8] sm:$0xf] %vm296_vm1, %v356_v23  ;;  %307 = vst.msk [vmem:[%s560_s3 + $0x28] sm:$0xf] %vm296_vm1, %v364_v24  ;;  %v357_v33 = vpack.c.bf16 %v181_v25, %v181_v25  ;;  %v365_v34 = vpack.c.bf16 %v213_v26, %v213_v26 }
  0xeb   :  { %297 = vst.msk [vmem:[%s560_s3] sm:$0xf] %vm296_vm1, %v354_v29  ;;  %305 = vst.msk [vmem:[%s560_s3 + $0x20] sm:$0xf] %vm296_vm1, %v362_v30  ;;  %v355_v35 = vpack.c.bf16 %v173_v31, %v173_v31  ;;  %v363_v36 = vpack.c.bf16 %v205_v32, %v205_v32 }
  0xec   :  { %300 = vst.msk [vmem:[%s560_s3 + $0xc] sm:$0xf] %vm296_vm1, %v357_v33  ;;  %308 = vst.msk [vmem:[%s560_s3 + $0x2c] sm:$0xf] %vm296_vm1, %v365_v34 }
  0xed   :  { %298 = vst.msk [vmem:[%s560_s3 + $0x4] sm:$0xf] %vm296_vm1, %v355_v35  ;;  %306 = vst.msk [vmem:[%s560_s3 + $0x24] sm:$0xf] %vm296_vm1, %v363_v36  ;;  %v396_v37 = vpop.f32.mrb[4].mxu0  ;;  %v404_v38 = vpop.f32.mrb[4].mxu1 }
  0xee   :  { %v194_v39 = vadd.f32 %v396_v37, %v317_v12  ;;  %v226_v40 = vadd.f32 %v404_v38, %v317_v12  ;;  %v185_v41 = vpop.f32.mrb[5].mxu0  ;;  %v217_v42 = vpop.f32.mrb[5].mxu1 }
  0xef   :  { %v186_v43 = vadd.f32 %v317_v12, %v185_v41  ;;  %v218_v44 = vadd.f32 %v317_v12, %v217_v42  ;;  %v397_v45 = vpop.f32.mrb[6].mxu0  ;;  %v405_v46 = vpop.f32.mrb[6].mxu1 }
  0xf0   :  { %v360_v47 = vpack.c.bf16 %v194_v39, %v194_v39  ;;  %v368_v48 = vpack.c.bf16 %v226_v40, %v226_v40  ;;  %v197_v49 = vadd.f32 %v397_v45, %v317_v12  ;;  %v229_v50 = vadd.f32 %v405_v46, %v317_v12  ;;  %v188_v51 = vpop.f32.mrb[7].mxu0  ;;  %v220_v52 = vpop.f32.mrb[7].mxu1 }
  0xf1   :  { %v358_v53 = vpack.c.bf16 %v186_v43, %v186_v43  ;;  %v366_v54 = vpack.c.bf16 %v218_v44, %v218_v44  ;;  %v189_v55 = vadd.f32 %v317_v12, %v188_v51  ;;  %v221_v56 = vadd.f32 %v317_v12, %v220_v52 }
  0xf2   :  { %303 = vst.msk [vmem:[%s560_s3 + $0x18] sm:$0xf] %vm296_vm1, %v360_v47  ;;  %311 = vst.msk [vmem:[%s560_s3 + $0x38] sm:$0xf] %vm296_vm1, %v368_v48  ;;  %v361_v57 = vpack.c.bf16 %v197_v49, %v197_v49  ;;  %v369_v58 = vpack.c.bf16 %v229_v50, %v229_v50 }
  0xf3   :  { %301 = vst.msk [vmem:[%s560_s3 + $0x10] sm:$0xf] %vm296_vm1, %v358_v53  ;;  %309 = vst.msk [vmem:[%s560_s3 + $0x30] sm:$0xf] %vm296_vm1, %v366_v54  ;;  %v359_v59 = vpack.c.bf16 %v189_v55, %v189_v55  ;;  %v367_v60 = vpack.c.bf16 %v221_v56, %v221_v56 }
  0xf4   :  { %304 = vst.msk [vmem:[%s560_s3 + $0x1c] sm:$0xf] %vm296_vm1, %v361_v57  ;;  %312 = vst.msk [vmem:[%s560_s3 + $0x3c] sm:$0xf] %vm296_vm1, %v369_v58 }
  0xf5   :  { %302 = vst.msk [vmem:[%s560_s3 + $0x14] sm:$0xf] %vm296_vm1, %v359_v59  ;;  %310 = vst.msk [vmem:[%s560_s3 + $0x34] sm:$0xf] %vm296_vm1, %v367_v60 }

</bundles_post_ra>
